<compile_context>
chip_gen: v7x
topology: tpu7x:2x2x1
jax: 0.10.0
libtpu: 0.0.40
codegen_flags: <defaults>
</compile_context>

<pallas_src>
import jax
import jax.numpy as jnp
from jax.experimental import pallas as pl
from jax.experimental.pallas import tpu as pltpu


def _make_shift_net_kernel(n_segment, c, fold, hw_tile, use_ksplit, compute_dtype):
    """Fused temporal shift + 1x1 conv over one (1, T, c, hw_tile) block."""

    def maybe_cast(v):
        return v if compute_dtype is None else v.astype(compute_dtype)

    def kernel(x_ref, w_ref, b_ref, o_ref):
        w = maybe_cast(w_ref[...])                          # (c, c)
        # Hoist the bias broadcast out of the unrolled T loop.
        bb = jnp.broadcast_to(b_ref[...], (c, hw_tile))     # (c, hw_tile)

        if use_ksplit:
            # Shift fused into the matmul K axis: pure addressing, no selects.
            w_next = w[:, :fold]               # columns hitting x[t+1, :fold]
            w_prev = w[:, fold:2 * fold]       # columns hitting x[t-1, fold:2f]
            w_same = w[:, 2 * fold:]           # columns hitting x[t,   2f:  ]
            for t in range(n_segment):
                acc = jnp.dot(w_same, maybe_cast(x_ref[0, t, 2 * fold:, :]),
                              preferred_element_type=jnp.float32)
                if t + 1 < n_segment:
                    acc = acc + jnp.dot(w_next,
                                        maybe_cast(x_ref[0, t + 1, :fold, :]),
                                        preferred_element_type=jnp.float32)
                if t > 0:
                    acc = acc + jnp.dot(w_prev,
                                        maybe_cast(x_ref[0, t - 1, fold:2 * fold, :]),
                                        preferred_element_type=jnp.float32)
                o_ref[0, t] = (acc + bb).astype(o_ref.dtype)
        else:
            # Tiny-channel path: per-frame channel-group select with (c, 1)
            # masks (sequence boundaries are static, handled at trace time).
            ch = jax.lax.broadcasted_iota(jnp.int32, (c, 1), 0)
            m_next = ch < fold                                    # pull t+1
            m_prev = jnp.logical_and(ch >= fold, ch < 2 * fold)   # pull t-1
            for t in range(n_segment):
                x_t = x_ref[0, t]                                 # (c, hw_tile)
                if t + 1 < n_segment:
                    s = jnp.where(m_next, x_ref[0, t + 1], x_t)
                else:
                    s = jnp.where(m_next, 0.0, x_t)
                if t > 0:
                    s = jnp.where(m_prev, x_ref[0, t - 1], s)
                else:
                    s = jnp.where(m_prev, 0.0, s)
                y = jnp.dot(w, maybe_cast(s), preferred_element_type=jnp.float32)
                o_ref[0, t] = (y + bb).astype(o_ref.dtype)

    return kernel


def _round_up(v, m):
    return (v + m - 1) // m * m


def _pick_hw_tile(hw_pad, n_segment, c, itemsize, budget_bytes):
    """Largest multiple-of-128 divisor of hw_pad whose resident
    (n_segment, c, hw_tile) block stays within budget_bytes."""
    per_lane = n_segment * c * itemsize
    max_lanes = max(128, (budget_bytes // per_lane) // 128 * 128)
    tile = 128
    cand = 256
    limit = min(hw_pad, max_lanes)
    while cand <= limit:
        if hw_pad % cand == 0:
            tile = cand
        cand += 128
    return tile


def temporal_shift_net(x, weight, bias, n_segment, n_div=8, hw_tile=None,
                       compute_dtype=None):
    """x: (nt, c, h, w) NCHW (like PyTorch).  Returns net(shift(x)) as (nt, c, h, w).

    For production runs carry x/weight in bf16 (or pass compute_dtype=bf16):
    halves HBM bytes on this memory-bound kernel and is MXU-native.
    """
    nt, c, h, w = x.shape
    assert nt % n_segment == 0
    n_batch = nt // n_segment
    fold = c // n_div
    hw = h * w
    # Lane-dense spatial axis: pad hw up to a multiple of 128; the pad columns
    # are sliced off after the call (unmasked vst instead of vst.msk).
    hw_pad = _round_up(hw, 128)

    xr = x.reshape(n_batch, n_segment, c, hw)
    if hw_pad != hw:
        xr = jnp.pad(xr, ((0, 0), (0, 0), (0, 0), (0, hw_pad - hw)))

    # Generation-aware VMEM sizing: <= ~1/12 of physical VMEM per resident
    # block (capped at 8 MiB), so double-buffered in+out blocks plus the small
    # per-frame temporaries stay well under half of VMEM even on v7x (64 MiB).
    try:
        vmem_cap = int(getattr(pltpu.get_tpu_info(), "vmem_capacity_bytes",
                               64 << 20))
    except Exception:
        vmem_cap = 64 << 20
    budget = max(1 << 20, min(8 << 20, vmem_cap // 12))
    if hw_tile is None:
        hw_tile = _pick_hw_tile(hw_pad, n_segment, c, x.dtype.itemsize, budget)
    assert hw_pad % hw_tile == 0
    vmem_limit = int(min(vmem_cap * 3 // 4, 96 << 20))

    b2 = bias.reshape(c, 1)
    blk = (1, n_segment, c, hw_tile)
    # Fuse the shift into the matmul K axis only when the fold-sized K chunks
    # are large and sublane-aligned enough to keep the MXU filled.
    use_ksplit = (fold >= 32) and (fold % 8 == 0) and (2 * fold < c)

    out = pl.pallas_call(
        _make_shift_net_kernel(n_segment, c, fold, hw_tile, use_ksplit,
                               compute_dtype),
        out_shape=jax.ShapeDtypeStruct((n_batch, n_segment, c, hw_pad), x.dtype),
        grid_spec=pltpu.PrefetchScalarGridSpec(
            num_scalar_prefetch=0,
            grid=(n_batch, hw_pad // hw_tile),
            in_specs=[
                pl.BlockSpec(blk, lambda b, j: (b, 0, 0, j)),
                pl.BlockSpec((c, c), lambda b, j: (0, 0)),
                pl.BlockSpec((c, 1), lambda b, j: (0, 0)),
            ],
            out_specs=pl.BlockSpec(blk, lambda b, j: (b, 0, 0, j)),
        ),
        compiler_params=pltpu.CompilerParams(
            dimension_semantics=("parallel", "parallel"),
            vmem_limit_bytes=vmem_limit),
    )(xr, weight, b2)

    if hw_pad != hw:
        out = out[..., :hw]
    return out.reshape(nt, c, h, w)


def _reference(x, weight, bias, n_segment, n_div):
    """Pure-JAX reference for TemporalShift.shift + 1x1-conv net."""
    nt, c, h, w = x.shape
    n_batch = nt // n_segment
    fold = c // n_div
    xr = x.reshape(n_batch, n_segment, c, h, w)
    out = jnp.zeros_like(xr)
    out = out.at[:, :-1, :fold].set(xr[:, 1:, :fold])
    out = out.at[:, 1:, fold:2 * fold].set(xr[:, :-1, fold:2 * fold])
    out = out.at[:, :, 2 * fold:].set(xr[:, :, 2 * fold:])
    shifted = out.reshape(nt, c, h, w)
    y = jnp.einsum('oc,nchw->nohw', weight, shifted,
                   precision=jax.lax.Precision.HIGHEST)
    return y + bias[None, :, None, None]


if __name__ == "__main__":
    key = jax.random.PRNGKey(0)

    # Case 1: small channels (mask-select path) + non-multiple-of-128 spatial
    # size (exercises the hw lane padding), like a real TSM 14x14 stage.
    n_batch, n_segment, c, h, w = 2, 8, 16, 14, 14       # fold = 2
    nt = n_batch * n_segment
    k1, k2, k3, k4 = jax.random.split(key, 4)
    x = jax.random.normal(k1, (nt, c, h, w), dtype=jnp.float32)
    weight = 0.1 * jax.random.normal(k2, (c, c), dtype=jnp.float32)   # net weight
    bias = 0.1 * jax.random.normal(k3, (c,), dtype=jnp.float32)       # net bias

    out = jax.block_until_ready(
        temporal_shift_net(x, weight, bias, n_segment, n_div=8))
    ref = _reference(x, weight, bias, n_segment, n_div=8)
    assert out.shape == (nt, c, h, w)
    assert jnp.allclose(out, ref, atol=1e-3, rtol=1e-3)

    # Case 2: larger channel count (fold = 32 -> K-split shift-in-matmul path).
    nb2, ns2, c2, h2, wd2 = 1, 4, 256, 16, 16
    nt2 = nb2 * ns2
    k5, k6, k7 = jax.random.split(k4, 3)
    x2 = jax.random.normal(k5, (nt2, c2, h2, wd2), dtype=jnp.float32)
    weight2 = 0.05 * jax.random.normal(k6, (c2, c2), dtype=jnp.float32)
    bias2 = 0.1 * jax.random.normal(k7, (c2,), dtype=jnp.float32)

    out2 = jax.block_until_ready(
        temporal_shift_net(x2, weight2, bias2, ns2, n_div=8))
    ref2 = _reference(x2, weight2, bias2, ns2, n_div=8)
    assert out2.shape == (nt2, c2, h2, wd2)
    assert jnp.allclose(out2, ref2, atol=5e-3, rtol=5e-3)

    print("KERNEL_OK")
</pallas_src>

<mosaic_0001>
module attributes {stable_mosaic.version = 11 : i64} {
  func.func @kernel(%arg0: i32, %arg1: i32, %arg2: memref<1x8x16x256xf32, #tpu.memory_space<vmem>>, %arg3: memref<16x16xf32, #tpu.memory_space<vmem>>, %arg4: memref<16x1xf32, #tpu.memory_space<vmem>>, %arg5: memref<1x8x16x256xf32, #tpu.memory_space<vmem>>) attributes {dimension_semantics = [#tpu.dimension_semantics<parallel>, #tpu.dimension_semantics<parallel>], iteration_bounds = array<i64: 2, 1>, scalar_prefetch = 0 : i64, scratch_operands = 0 : i64, tpu.core_type = #tpu.core_type<tc>, window_params = [{transform_indices = @transform_0, window_bounds = array<i64: 1, 8, 16, 256>}, {pipeline_mode = #tpu.pipeline_mode<synchronous>, transform_indices = @transform_1, window_bounds = array<i64: 16, 16>}, {pipeline_mode = #tpu.pipeline_mode<synchronous>, transform_indices = @transform_2, window_bounds = array<i64: 16, 1>}, {transform_indices = @transform_3, window_bounds = array<i64: 1, 8, 16, 256>}]} {
    %c0 = arith.constant 0 : index
    %c0_0 = arith.constant 0 : index
    %0 = vector.load %arg3[%c0, %c0_0] : memref<16x16xf32, #tpu.memory_space<vmem>>, vector<16x16xf32>
    %c0_1 = arith.constant 0 : index
    %c0_2 = arith.constant 0 : index
    %1 = vector.load %arg4[%c0_1, %c0_2] : memref<16x1xf32, #tpu.memory_space<vmem>>, vector<16x1xf32>
    %2 = vector.shape_cast %1 : vector<16x1xf32> to vector<16x1xf32>
    %3 = vector.broadcast %2 : vector<16x1xf32> to vector<16x256xf32>
    %4 = tpu.iota {dimensions = array<i32: 0>} : vector<16x1xi32>
    %c2_i32 = arith.constant 2 : i32
    %5 = vector.broadcast %c2_i32 : i32 to vector<16x1xi32>
    %6 = arith.cmpi slt, %4, %5 : vector<16x1xi32>
    %c2_i32_3 = arith.constant 2 : i32
    %7 = vector.broadcast %c2_i32_3 : i32 to vector<16x1xi32>
    %8 = arith.cmpi sge, %4, %7 : vector<16x1xi32>
    %c4_i32 = arith.constant 4 : i32
    %9 = vector.broadcast %c4_i32 : i32 to vector<16x1xi32>
    %10 = arith.cmpi slt, %4, %9 : vector<16x1xi32>
    %11 = arith.andi %8, %10 : vector<16x1xi1>
    %c0_4 = arith.constant 0 : index
    %c0_5 = arith.constant 0 : index
    %c0_6 = arith.constant 0 : index
    %c0_7 = arith.constant 0 : index
    %12 = vector.load %arg2[%c0_4, %c0_5, %c0_6, %c0_7] : memref<1x8x16x256xf32, #tpu.memory_space<vmem>>, vector<1x1x16x256xf32>
    %13 = vector.shape_cast %12 : vector<1x1x16x256xf32> to vector<16x256xf32>
    %c0_8 = arith.constant 0 : index
    %c1 = arith.constant 1 : index
    %c0_9 = arith.constant 0 : index
    %c0_10 = arith.constant 0 : index
    %14 = vector.load %arg2[%c0_8, %c1, %c0_9, %c0_10] : memref<1x8x16x256xf32, #tpu.memory_space<vmem>>, vector<1x1x16x256xf32>
    %15 = vector.shape_cast %14 : vector<1x1x16x256xf32> to vector<16x256xf32>
    %16 = vector.shape_cast %6 : vector<16x1xi1> to vector<16x1xi1>
    %17 = vector.broadcast %16 : vector<16x1xi1> to vector<16x256xi1>
    %18 = arith.select %17, %15, %13 : vector<16x256xi1>, vector<16x256xf32>
    %cst = arith.constant 0.000000e+00 : f32
    %19 = vector.shape_cast %11 : vector<16x1xi1> to vector<16x1xi1>
    %20 = vector.broadcast %19 : vector<16x1xi1> to vector<16x256xi1>
    %21 = vector.broadcast %cst : f32 to vector<16x256xf32>
    %22 = arith.select %20, %21, %18 : vector<16x256xi1>, vector<16x256xf32>
    %cst_11 = arith.constant dense<0.000000e+00> : vector<16x256xf32>
    %23 = tpu.matmul %0, %22, %cst_11 {dimension_numbers = #tpu.dot_dimension_numbers<[1], [0], [0], [1], [0, 0, 1, 1], [], []>} : vector<16x16xf32>, vector<16x256xf32>, vector<16x256xf32> -> vector<16x256xf32>
    %24 = arith.addf %23, %3 : vector<16x256xf32>
    %c0_12 = arith.constant 0 : index
    %c0_13 = arith.constant 0 : index
    %c0_14 = arith.constant 0 : index
    %c0_15 = arith.constant 0 : index
    %25 = vector.load %arg5[%c0_12, %c0_13, %c0_14, %c0_15] : memref<1x8x16x256xf32, #tpu.memory_space<vmem>>, vector<1x1x16x256xf32>
    %26 = vector.shape_cast %25 : vector<1x1x16x256xf32> to vector<16x256xf32>
    %27 = vector.shape_cast %24 : vector<16x256xf32> to vector<1x1x16x256xf32>
    tpu.vector_store %arg5[%c0_12, %c0_13, %c0_14, %c0_15], %27 {strides = array<i32>} : memref<1x8x16x256xf32, #tpu.memory_space<vmem>>, vector<1x1x16x256xf32>,
    %c0_16 = arith.constant 0 : index
    %c1_17 = arith.constant 1 : index
    %c0_18 = arith.constant 0 : index
    %c0_19 = arith.constant 0 : index
    %28 = vector.load %arg2[%c0_16, %c1_17, %c0_18, %c0_19] : memref<1x8x16x256xf32, #tpu.memory_space<vmem>>, vector<1x1x16x256xf32>
    %29 = vector.shape_cast %28 : vector<1x1x16x256xf32> to vector<16x256xf32>
    %c0_20 = arith.constant 0 : index
    %c2 = arith.constant 2 : index
    %c0_21 = arith.constant 0 : index
    %c0_22 = arith.constant 0 : index
    %30 = vector.load %arg2[%c0_20, %c2, %c0_21, %c0_22] : memref<1x8x16x256xf32, #tpu.memory_space<vmem>>, vector<1x1x16x256xf32>
    %31 = vector.shape_cast %30 : vector<1x1x16x256xf32> to vector<16x256xf32>
    %32 = vector.shape_cast %6 : vector<16x1xi1> to vector<16x1xi1>
    %33 = vector.broadcast %32 : vector<16x1xi1> to vector<16x256xi1>
    %34 = arith.select %33, %31, %29 : vector<16x256xi1>, vector<16x256xf32>
    %c0_23 = arith.constant 0 : index
    %c0_24 = arith.constant 0 : index
    %c0_25 = arith.constant 0 : index
    %c0_26 = arith.constant 0 : index
    %35 = vector.load %arg2[%c0_23, %c0_24, %c0_25, %c0_26] : memref<1x8x16x256xf32, #tpu.memory_space<vmem>>, vector<1x1x16x256xf32>
    %36 = vector.shape_cast %35 : vector<1x1x16x256xf32> to vector<16x256xf32>
    %37 = vector.shape_cast %11 : vector<16x1xi1> to vector<16x1xi1>
    %38 = vector.broadcast %37 : vector<16x1xi1> to vector<16x256xi1>
    %39 = arith.select %38, %36, %34 : vector<16x256xi1>, vector<16x256xf32>
    %cst_27 = arith.constant dense<0.000000e+00> : vector<16x256xf32>
    %40 = tpu.matmul %0, %39, %cst_27 {dimension_numbers = #tpu.dot_dimension_numbers<[1], [0], [0], [1], [0, 0, 1, 1], [], []>} : vector<16x16xf32>, vector<16x256xf32>, vector<16x256xf32> -> vector<16x256xf32>
    %41 = arith.addf %40, %3 : vector<16x256xf32>
    %c0_28 = arith.constant 0 : index
    %c1_29 = arith.constant 1 : index
    %c0_30 = arith.constant 0 : index
    %c0_31 = arith.constant 0 : index
    %42 = vector.load %arg5[%c0_28, %c1_29, %c0_30, %c0_31] : memref<1x8x16x256xf32, #tpu.memory_space<vmem>>, vector<1x1x16x256xf32>
    %43 = vector.shape_cast %42 : vector<1x1x16x256xf32> to vector<16x256xf32>
    %44 = vector.shape_cast %41 : vector<16x256xf32> to vector<1x1x16x256xf32>
    tpu.vector_store %arg5[%c0_28, %c1_29, %c0_30, %c0_31], %44 {strides = array<i32>} : memref<1x8x16x256xf32, #tpu.memory_space<vmem>>, vector<1x1x16x256xf32>,
    %c0_32 = arith.constant 0 : index
    %c2_33 = arith.constant 2 : index
    %c0_34 = arith.constant 0 : index
    %c0_35 = arith.constant 0 : index
    %45 = vector.load %arg2[%c0_32, %c2_33, %c0_34, %c0_35] : memref<1x8x16x256xf32, #tpu.memory_space<vmem>>, vector<1x1x16x256xf32>
    %46 = vector.shape_cast %45 : vector<1x1x16x256xf32> to vector<16x256xf32>
    %c0_36 = arith.constant 0 : index
    %c3 = arith.constant 3 : index
    %c0_37 = arith.constant 0 : index
    %c0_38 = arith.constant 0 : index
    %47 = vector.load %arg2[%c0_36, %c3, %c0_37, %c0_38] : memref<1x8x16x256xf32, #tpu.memory_space<vmem>>, vector<1x1x16x256xf32>
    %48 = vector.shape_cast %47 : vector<1x1x16x256xf32> to vector<16x256xf32>
    %49 = vector.shape_cast %6 : vector<16x1xi1> to vector<16x1xi1>
    %50 = vector.broadcast %49 : vector<16x1xi1> to vector<16x256xi1>
    %51 = arith.select %50, %48, %46 : vector<16x256xi1>, vector<16x256xf32>
    %c0_39 = arith.constant 0 : index
    %c1_40 = arith.constant 1 : index
    %c0_41 = arith.constant 0 : index
    %c0_42 = arith.constant 0 : index
    %52 = vector.load %arg2[%c0_39, %c1_40, %c0_41, %c0_42] : memref<1x8x16x256xf32, #tpu.memory_space<vmem>>, vector<1x1x16x256xf32>
    %53 = vector.shape_cast %52 : vector<1x1x16x256xf32> to vector<16x256xf32>
    %54 = vector.shape_cast %11 : vector<16x1xi1> to vector<16x1xi1>
    %55 = vector.broadcast %54 : vector<16x1xi1> to vector<16x256xi1>
    %56 = arith.select %55, %53, %51 : vector<16x256xi1>, vector<16x256xf32>
    %cst_43 = arith.constant dense<0.000000e+00> : vector<16x256xf32>
    %57 = tpu.matmul %0, %56, %cst_43 {dimension_numbers = #tpu.dot_dimension_numbers<[1], [0], [0], [1], [0, 0, 1, 1], [], []>} : vector<16x16xf32>, vector<16x256xf32>, vector<16x256xf32> -> vector<16x256xf32>
    %58 = arith.addf %57, %3 : vector<16x256xf32>
    %c0_44 = arith.constant 0 : index
    %c2_45 = arith.constant 2 : index
    %c0_46 = arith.constant 0 : index
    %c0_47 = arith.constant 0 : index
    %59 = vector.load %arg5[%c0_44, %c2_45, %c0_46, %c0_47] : memref<1x8x16x256xf32, #tpu.memory_space<vmem>>, vector<1x1x16x256xf32>
    %60 = vector.shape_cast %59 : vector<1x1x16x256xf32> to vector<16x256xf32>
    %61 = vector.shape_cast %58 : vector<16x256xf32> to vector<1x1x16x256xf32>
    tpu.vector_store %arg5[%c0_44, %c2_45, %c0_46, %c0_47], %61 {strides = array<i32>} : memref<1x8x16x256xf32, #tpu.memory_space<vmem>>, vector<1x1x16x256xf32>,
    %c0_48 = arith.constant 0 : index
    %c3_49 = arith.constant 3 : index
    %c0_50 = arith.constant 0 : index
    %c0_51 = arith.constant 0 : index
    %62 = vector.load %arg2[%c0_48, %c3_49, %c0_50, %c0_51] : memref<1x8x16x256xf32, #tpu.memory_space<vmem>>, vector<1x1x16x256xf32>
    %63 = vector.shape_cast %62 : vector<1x1x16x256xf32> to vector<16x256xf32>
    %c0_52 = arith.constant 0 : index
    %c4 = arith.constant 4 : index
    %c0_53 = arith.constant 0 : index
    %c0_54 = arith.constant 0 : index
    %64 = vector.load %arg2[%c0_52, %c4, %c0_53, %c0_54] : memref<1x8x16x256xf32, #tpu.memory_space<vmem>>, vector<1x1x16x256xf32>
    %65 = vector.shape_cast %64 : vector<1x1x16x256xf32> to vector<16x256xf32>
    %66 = vector.shape_cast %6 : vector<16x1xi1> to vector<16x1xi1>
    %67 = vector.broadcast %66 : vector<16x1xi1> to vector<16x256xi1>
    %68 = arith.select %67, %65, %63 : vector<16x256xi1>, vector<16x256xf32>
    %c0_55 = arith.constant 0 : index
    %c2_56 = arith.constant 2 : index
    %c0_57 = arith.constant 0 : index
    %c0_58 = arith.constant 0 : index
    %69 = vector.load %arg2[%c0_55, %c2_56, %c0_57, %c0_58] : memref<1x8x16x256xf32, #tpu.memory_space<vmem>>, vector<1x1x16x256xf32>
    %70 = vector.shape_cast %69 : vector<1x1x16x256xf32> to vector<16x256xf32>
    %71 = vector.shape_cast %11 : vector<16x1xi1> to vector<16x1xi1>
    %72 = vector.broadcast %71 : vector<16x1xi1> to vector<16x256xi1>
    %73 = arith.select %72, %70, %68 : vector<16x256xi1>, vector<16x256xf32>
    %cst_59 = arith.constant dense<0.000000e+00> : vector<16x256xf32>
    %74 = tpu.matmul %0, %73, %cst_59 {dimension_numbers = #tpu.dot_dimension_numbers<[1], [0], [0], [1], [0, 0, 1, 1], [], []>} : vector<16x16xf32>, vector<16x256xf32>, vector<16x256xf32> -> vector<16x256xf32>
    %75 = arith.addf %74, %3 : vector<16x256xf32>
    %c0_60 = arith.constant 0 : index
    %c3_61 = arith.constant 3 : index
    %c0_62 = arith.constant 0 : index
    %c0_63 = arith.constant 0 : index
    %76 = vector.load %arg5[%c0_60, %c3_61, %c0_62, %c0_63] : memref<1x8x16x256xf32, #tpu.memory_space<vmem>>, vector<1x1x16x256xf32>
    %77 = vector.shape_cast %76 : vector<1x1x16x256xf32> to vector<16x256xf32>
    %78 = vector.shape_cast %75 : vector<16x256xf32> to vector<1x1x16x256xf32>
    tpu.vector_store %arg5[%c0_60, %c3_61, %c0_62, %c0_63], %78 {strides = array<i32>} : memref<1x8x16x256xf32, #tpu.memory_space<vmem>>, vector<1x1x16x256xf32>,
    %c0_64 = arith.constant 0 : index
    %c4_65 = arith.constant 4 : index
    %c0_66 = arith.constant 0 : index
    %c0_67 = arith.constant 0 : index
    %79 = vector.load %arg2[%c0_64, %c4_65, %c0_66, %c0_67] : memref<1x8x16x256xf32, #tpu.memory_space<vmem>>, vector<1x1x16x256xf32>
    %80 = vector.shape_cast %79 : vector<1x1x16x256xf32> to vector<16x256xf32>
    %c0_68 = arith.constant 0 : index
    %c5 = arith.constant 5 : index
    %c0_69 = arith.constant 0 : index
    %c0_70 = arith.constant 0 : index
    %81 = vector.load %arg2[%c0_68, %c5, %c0_69, %c0_70] : memref<1x8x16x256xf32, #tpu.memory_space<vmem>>, vector<1x1x16x256xf32>
    %82 = vector.shape_cast %81 : vector<1x1x16x256xf32> to vector<16x256xf32>
    %83 = vector.shape_cast %6 : vector<16x1xi1> to vector<16x1xi1>
    %84 = vector.broadcast %83 : vector<16x1xi1> to vector<16x256xi1>
    %85 = arith.select %84, %82, %80 : vector<16x256xi1>, vector<16x256xf32>
    %c0_71 = arith.constant 0 : index
    %c3_72 = arith.constant 3 : index
    %c0_73 = arith.constant 0 : index
    %c0_74 = arith.constant 0 : index
    %86 = vector.load %arg2[%c0_71, %c3_72, %c0_73, %c0_74] : memref<1x8x16x256xf32, #tpu.memory_space<vmem>>, vector<1x1x16x256xf32>
    %87 = vector.shape_cast %86 : vector<1x1x16x256xf32> to vector<16x256xf32>
    %88 = vector.shape_cast %11 : vector<16x1xi1> to vector<16x1xi1>
    %89 = vector.broadcast %88 : vector<16x1xi1> to vector<16x256xi1>
    %90 = arith.select %89, %87, %85 : vector<16x256xi1>, vector<16x256xf32>
    %cst_75 = arith.constant dense<0.000000e+00> : vector<16x256xf32>
    %91 = tpu.matmul %0, %90, %cst_75 {dimension_numbers = #tpu.dot_dimension_numbers<[1], [0], [0], [1], [0, 0, 1, 1], [], []>} : vector<16x16xf32>, vector<16x256xf32>, vector<16x256xf32> -> vector<16x256xf32>
    %92 = arith.addf %91, %3 : vector<16x256xf32>
    %c0_76 = arith.constant 0 : index
    %c4_77 = arith.constant 4 : index
    %c0_78 = arith.constant 0 : index
    %c0_79 = arith.constant 0 : index
    %93 = vector.load %arg5[%c0_76, %c4_77, %c0_78, %c0_79] : memref<1x8x16x256xf32, #tpu.memory_space<vmem>>, vector<1x1x16x256xf32>
    %94 = vector.shape_cast %93 : vector<1x1x16x256xf32> to vector<16x256xf32>
    %95 = vector.shape_cast %92 : vector<16x256xf32> to vector<1x1x16x256xf32>
    tpu.vector_store %arg5[%c0_76, %c4_77, %c0_78, %c0_79], %95 {strides = array<i32>} : memref<1x8x16x256xf32, #tpu.memory_space<vmem>>, vector<1x1x16x256xf32>,
    %c0_80 = arith.constant 0 : index
    %c5_81 = arith.constant 5 : index
    %c0_82 = arith.constant 0 : index
    %c0_83 = arith.constant 0 : index
    %96 = vector.load %arg2[%c0_80, %c5_81, %c0_82, %c0_83] : memref<1x8x16x256xf32, #tpu.memory_space<vmem>>, vector<1x1x16x256xf32>
    %97 = vector.shape_cast %96 : vector<1x1x16x256xf32> to vector<16x256xf32>
    %c0_84 = arith.constant 0 : index
    %c6 = arith.constant 6 : index
    %c0_85 = arith.constant 0 : index
    %c0_86 = arith.constant 0 : index
    %98 = vector.load %arg2[%c0_84, %c6, %c0_85, %c0_86] : memref<1x8x16x256xf32, #tpu.memory_space<vmem>>, vector<1x1x16x256xf32>
    %99 = vector.shape_cast %98 : vector<1x1x16x256xf32> to vector<16x256xf32>
    %100 = vector.shape_cast %6 : vector<16x1xi1> to vector<16x1xi1>
    %101 = vector.broadcast %100 : vector<16x1xi1> to vector<16x256xi1>
    %102 = arith.select %101, %99, %97 : vector<16x256xi1>, vector<16x256xf32>
    %c0_87 = arith.constant 0 : index
    %c4_88 = arith.constant 4 : index
    %c0_89 = arith.constant 0 : index
    %c0_90 = arith.constant 0 : index
    %103 = vector.load %arg2[%c0_87, %c4_88, %c0_89, %c0_90] : memref<1x8x16x256xf32, #tpu.memory_space<vmem>>, vector<1x1x16x256xf32>
    %104 = vector.shape_cast %103 : vector<1x1x16x256xf32> to vector<16x256xf32>
    %105 = vector.shape_cast %11 : vector<16x1xi1> to vector<16x1xi1>
    %106 = vector.broadcast %105 : vector<16x1xi1> to vector<16x256xi1>
    %107 = arith.select %106, %104, %102 : vector<16x256xi1>, vector<16x256xf32>
    %cst_91 = arith.constant dense<0.000000e+00> : vector<16x256xf32>
    %108 = tpu.matmul %0, %107, %cst_91 {dimension_numbers = #tpu.dot_dimension_numbers<[1], [0], [0], [1], [0, 0, 1, 1], [], []>} : vector<16x16xf32>, vector<16x256xf32>, vector<16x256xf32> -> vector<16x256xf32>
    %109 = arith.addf %108, %3 : vector<16x256xf32>
    %c0_92 = arith.constant 0 : index
    %c5_93 = arith.constant 5 : index
    %c0_94 = arith.constant 0 : index
    %c0_95 = arith.constant 0 : index
    %110 = vector.load %arg5[%c0_92, %c5_93, %c0_94, %c0_95] : memref<1x8x16x256xf32, #tpu.memory_space<vmem>>, vector<1x1x16x256xf32>
    %111 = vector.shape_cast %110 : vector<1x1x16x256xf32> to vector<16x256xf32>
    %112 = vector.shape_cast %109 : vector<16x256xf32> to vector<1x1x16x256xf32>
    tpu.vector_store %arg5[%c0_92, %c5_93, %c0_94, %c0_95], %112 {strides = array<i32>} : memref<1x8x16x256xf32, #tpu.memory_space<vmem>>, vector<1x1x16x256xf32>,
    %c0_96 = arith.constant 0 : index
    %c6_97 = arith.constant 6 : index
    %c0_98 = arith.constant 0 : index
    %c0_99 = arith.constant 0 : index
    %113 = vector.load %arg2[%c0_96, %c6_97, %c0_98, %c0_99] : memref<1x8x16x256xf32, #tpu.memory_space<vmem>>, vector<1x1x16x256xf32>
    %114 = vector.shape_cast %113 : vector<1x1x16x256xf32> to vector<16x256xf32>
    %c0_100 = arith.constant 0 : index
    %c7 = arith.constant 7 : index
    %c0_101 = arith.constant 0 : index
    %c0_102 = arith.constant 0 : index
    %115 = vector.load %arg2[%c0_100, %c7, %c0_101, %c0_102] : memref<1x8x16x256xf32, #tpu.memory_space<vmem>>, vector<1x1x16x256xf32>
    %116 = vector.shape_cast %115 : vector<1x1x16x256xf32> to vector<16x256xf32>
    %117 = vector.shape_cast %6 : vector<16x1xi1> to vector<16x1xi1>
    %118 = vector.broadcast %117 : vector<16x1xi1> to vector<16x256xi1>
    %119 = arith.select %118, %116, %114 : vector<16x256xi1>, vector<16x256xf32>
    %c0_103 = arith.constant 0 : index
    %c5_104 = arith.constant 5 : index
    %c0_105 = arith.constant 0 : index
    %c0_106 = arith.constant 0 : index
    %120 = vector.load %arg2[%c0_103, %c5_104, %c0_105, %c0_106] : memref<1x8x16x256xf32, #tpu.memory_space<vmem>>, vector<1x1x16x256xf32>
    %121 = vector.shape_cast %120 : vector<1x1x16x256xf32> to vector<16x256xf32>
    %122 = vector.shape_cast %11 : vector<16x1xi1> to vector<16x1xi1>
    %123 = vector.broadcast %122 : vector<16x1xi1> to vector<16x256xi1>
    %124 = arith.select %123, %121, %119 : vector<16x256xi1>, vector<16x256xf32>
    %cst_107 = arith.constant dense<0.000000e+00> : vector<16x256xf32>
    %125 = tpu.matmul %0, %124, %cst_107 {dimension_numbers = #tpu.dot_dimension_numbers<[1], [0], [0], [1], [0, 0, 1, 1], [], []>} : vector<16x16xf32>, vector<16x256xf32>, vector<16x256xf32> -> vector<16x256xf32>
    %126 = arith.addf %125, %3 : vector<16x256xf32>
    %c0_108 = arith.constant 0 : index
    %c6_109 = arith.constant 6 : index
    %c0_110 = arith.constant 0 : index
    %c0_111 = arith.constant 0 : index
    %127 = vector.load %arg5[%c0_108, %c6_109, %c0_110, %c0_111] : memref<1x8x16x256xf32, #tpu.memory_space<vmem>>, vector<1x1x16x256xf32>
    %128 = vector.shape_cast %127 : vector<1x1x16x256xf32> to vector<16x256xf32>
    %129 = vector.shape_cast %126 : vector<16x256xf32> to vector<1x1x16x256xf32>
    tpu.vector_store %arg5[%c0_108, %c6_109, %c0_110, %c0_111], %129 {strides = array<i32>} : memref<1x8x16x256xf32, #tpu.memory_space<vmem>>, vector<1x1x16x256xf32>,
    %c0_112 = arith.constant 0 : index
    %c7_113 = arith.constant 7 : index
    %c0_114 = arith.constant 0 : index
    %c0_115 = arith.constant 0 : index
    %130 = vector.load %arg2[%c0_112, %c7_113, %c0_114, %c0_115] : memref<1x8x16x256xf32, #tpu.memory_space<vmem>>, vector<1x1x16x256xf32>
    %131 = vector.shape_cast %130 : vector<1x1x16x256xf32> to vector<16x256xf32>
    %cst_116 = arith.constant 0.000000e+00 : f32
    %132 = vector.shape_cast %6 : vector<16x1xi1> to vector<16x1xi1>
    %133 = vector.broadcast %132 : vector<16x1xi1> to vector<16x256xi1>
    %134 = vector.broadcast %cst_116 : f32 to vector<16x256xf32>
    %135 = arith.select %133, %134, %131 : vector<16x256xi1>, vector<16x256xf32>
    %c0_117 = arith.constant 0 : index
    %c6_118 = arith.constant 6 : index
    %c0_119 = arith.constant 0 : index
    %c0_120 = arith.constant 0 : index
    %136 = vector.load %arg2[%c0_117, %c6_118, %c0_119, %c0_120] : memref<1x8x16x256xf32, #tpu.memory_space<vmem>>, vector<1x1x16x256xf32>
    %137 = vector.shape_cast %136 : vector<1x1x16x256xf32> to vector<16x256xf32>
    %138 = vector.shape_cast %11 : vector<16x1xi1> to vector<16x1xi1>
    %139 = vector.broadcast %138 : vector<16x1xi1> to vector<16x256xi1>
    %140 = arith.select %139, %137, %135 : vector<16x256xi1>, vector<16x256xf32>
    %cst_121 = arith.constant dense<0.000000e+00> : vector<16x256xf32>
    %141 = tpu.matmul %0, %140, %cst_121 {dimension_numbers = #tpu.dot_dimension_numbers<[1], [0], [0], [1], [0, 0, 1, 1], [], []>} : vector<16x16xf32>, vector<16x256xf32>, vector<16x256xf32> -> vector<16x256xf32>
    %142 = arith.addf %141, %3 : vector<16x256xf32>
    %c0_122 = arith.constant 0 : index
    %c7_123 = arith.constant 7 : index
    %c0_124 = arith.constant 0 : index
    %c0_125 = arith.constant 0 : index
    %143 = vector.load %arg5[%c0_122, %c7_123, %c0_124, %c0_125] : memref<1x8x16x256xf32, #tpu.memory_space<vmem>>, vector<1x1x16x256xf32>
    %144 = vector.shape_cast %143 : vector<1x1x16x256xf32> to vector<16x256xf32>
    %145 = vector.shape_cast %142 : vector<16x256xf32> to vector<1x1x16x256xf32>
    tpu.vector_store %arg5[%c0_122, %c7_123, %c0_124, %c0_125], %145 {strides = array<i32>} : memref<1x8x16x256xf32, #tpu.memory_space<vmem>>, vector<1x1x16x256xf32>,
    return
  }
  func.func @transform_0(%arg0: i32, %arg1: i32) -> (i32, i32, i32, i32) {
    %c0_i32 = arith.constant 0 : i32
    %c0_i32_0 = arith.constant 0 : i32
    %c0_i32_1 = arith.constant 0 : i32
    return %arg0, %c0_i32, %c0_i32_0, %arg1 : i32, i32, i32, i32
  }
  func.func @transform_1(%arg0: i32, %arg1: i32) -> (i32, i32) {
    %c0_i32 = arith.constant 0 : i32
    %c0_i32_0 = arith.constant 0 : i32
    %c0_i32_1 = arith.constant 0 : i32
    return %c0_i32, %c0_i32_0 : i32, i32
  }
  func.func @transform_2(%arg0: i32, %arg1: i32) -> (i32, i32) {
    %c0_i32 = arith.constant 0 : i32
    %c0_i32_0 = arith.constant 0 : i32
    %c0_i32_1 = arith.constant 0 : i32
    return %c0_i32, %c0_i32_0 : i32, i32
  }
  func.func @transform_3(%arg0: i32, %arg1: i32) -> (i32, i32, i32, i32) {
    %c0_i32 = arith.constant 0 : i32
    %c0_i32_0 = arith.constant 0 : i32
    %c0_i32_1 = arith.constant 0 : i32
    return %arg0, %c0_i32, %c0_i32_0, %arg1 : i32, i32, i32, i32
  }
}

</mosaic_0001>

<bundles_post_ra>
// kernel: tpu_custom_call.1
= control target key start
LH: loop header
LB: loop body
LE: loop exit
PB: predicated region body
PF: predicated region fallthrough
CT: control target
= control target key end

     0   :  { %8 = vsyncpa [#allocation3], 0  ;;  %s1985_s0 = inlined_call_operand.hbm [shape: f32[2,8,16,256], index: 0, kind: input, shape index: {}]   ;;  %s1986_s1 = inlined_call_operand.vmem [shape: f32[16,16], index: 1, kind: input, shape index: {}]   ;;  %s1987_s2 = inlined_call_operand.vmem [shape: f32[16,1], index: 2, kind: input, shape index: {}]   ;;  %s1988_s3 = inlined_call_operand.hbm [shape: f32[2,8,16,256], index: 3, kind: output, shape index: {}]  }
   0x1   :  { %10 = vsyncpa [#allocation3 + $0x1], 0 }
   0x2   :  { %11 = vsyncpa [#allocation4], 0 }
   0x3   :  { %13 = vsyncpa [#allocation4 + $0x1], 0  ;;  %s1558_s12 = smov 0   ;;  %s1560_s13 = smov 0  }
   0x4   :  { %s1562_s14 = smov 0   ;;  %s1564_s15 = smov 0  }
   0x5   :  { %s1566_s16 = smov 0   ;;  %s1568_s17 = smov 0  }
   0x6 LB: > { %s1166_s18 = sadd.s32 4294967295, %s1527_s17   ;;  %s1167_s19 = sadd.s32 4294967294, %s1527_s17   ;;  %s1527_s17 = sphi %s1568_s17, %s19_s17   ;;  %s1523_s16 = sphi %s1566_s16, %s2007_s16   ;;  %s1519_s15 = sphi %s1564_s15, %s2006_s15   ;;  %s1515_s14 = sphi %s1562_s14, %s2005_s14   ;;  %s1511_s13 = sphi %s1560_s13, %s2004_s13   ;;  %s1507_s12 = sphi %s1558_s12, %s2003_s12  }
   0x7   : > { %s31_s20 = sadd.s32 1, %s1523_s16  ;;  %s40_s21 = sadd.s32 1, %s1515_s14 }
   0x8   : > { %p33_p0 = scmp.ge.s32.totalorder %s31_s20, 2  ;;  %p47_p1 = scmp.ne.s32.totalorder %s1515_s14, %s1511_s13 }
   0x9   : > { %p48_p2 = scmp.eq.s32.totalorder %s1527_s17, 0  ;;  %p53_p3 = scmp.ne.s32.totalorder %s1511_s13, %s1507_s12 }
   0xa   : > { %s2009_s20 = smov (%p33_p0, %s31_s20), 0  ;;  %p54_p5 = scmp.eq.s32.totalorder %s1166_s18, 0 }
   0xb   : > { %p1599_p4 = por %p48_p2, %p47_p1  ;;  %s35_s23 = ssub.s32 %s1523_s16, %s2009_s20 }
   0xc   : > { %p121_p6 = scmp.eq.s32.totalorder %s1166_s18, 1  ;;  %p38_p7 = scmp.eq.s32.totalorder %s35_s23, 0 }
   0xd   : > { %p1605_p8 = por %p54_p5, %p53_p3  ;;  %p127_p10 = scmp.eq.s32.totalorder %s1167_s19, 1 }
   0xe   : > { %p1609_p9 = por %p121_p6, %p47_p1  ;;  %p1357_p13 = scmp.lt.s32.totalorder %s1527_s17, 2 }
   0xf   : > { %s1614_s26 = scalar_select %p38_p7, %s1515_s14, %s40_s21  }
  0x10   : > { %s1992_s25 = scalar_select %p1609_p9, 1, 0 }
  0x11   : > { %p1616_p11 = por %p127_p10, %p53_p3  ;;  %s153_s28 = sand.u32 1, %s1515_s14  }
  0x12   : > { %s1170_s29 = sshll.u32 %s153_s28, 8  ;;  %s1309_s30 = sshll.u32 %s1523_s16, 12 }
  0x13   : > { %s1993_s27 = scalar_select %p1616_p11, 1, 0 }
  0x14   : > { %s1627_s6 = scalar_lea.hbm %s1985_s0, %s1309_s30  ;;  %s157_s7 = scalar_lea.vmem [#allocation2], %s1170_s29 }
  0x15   : > { %s166_s8 = sshll.u32 %s157_s7, 4  ;;  %p1633_p0 = pnand %p1357_p13, %p1599_p4  ;;  %s1629_s8 = int_to_ptr.vmem [resolvable:$true] %s166_s8 }
  0x16   : > { %s1638_s10 = scalar_lea.sflag [#allocation3], %s153_s28  ;;  %s1415_s11 = scalar_lea.hbm %s1627_s6, 4096 }
  0x17   : > { %p1416_p2 = scmp.ne.s32.totalorder %s1627_s6, %s1415_s11  ;;  %p1417_p3 = pneg %p1633_p0 }
  0x18   : > { %s1420_s21 = scalar_lea.hbm %s1985_s0, 8192  ;;  %p1421_p4 = scmp.lt.u32.totalorder %s1627_s6, %s1985_s0 }
  0x19   : > { %p1418_p5 = pnand %p1417_p3, %p1416_p2  ;;  %p1422_p7 = scmp.lt.u32.totalorder %s1420_s21, %s1415_s11 }
  0x1a   : > { %p1424_p13 = scmp.lt.u32.totalorder %s1415_s11, %s1627_s6 }
  0x1b   : > { %p1419_p6 = pneg %p1418_p5  ;;  %p1423_p10 = por %p1422_p7, %p1421_p4 }
  0x1d   : > { %p1425_p12 = por %p1424_p13, %p1423_p10 }
  0x1f   : > { %p1426_p1 = pnand %p1425_p12, %p1419_p6 }
  0x21   : > { %1429 = shalt.err (!%p1426_p1)
}
  0x22   : > { %s1430_s28 = scalar_lea.vmem %s1629_s8, 4096  ;;  %s1529_s29 = smov [#allocation2]  }
  0x23   : > { %p1431_p2 = scmp.ne.s32.totalorder %s1629_s8, %s1430_s28  ;;  %s1435_s30 = sshll.u32 %s1529_s29, 4  ;;  %s1436_s30 = int_to_ptr.vmem [resolvable:$false] %s1435_s30 }
  0x24   : > { %s1437_s4 = scalar_lea.vmem %s1436_s30, 8192  ;;  %p1438_p9 = scmp.lt.s32.totalorder %s1629_s8, %s1436_s30 }
  0x25   : > { %p1433_p5 = pnand %p1431_p2, %p1417_p3  ;;  %p1439_p4 = scmp.lt.s32.totalorder %s1437_s4, %s1430_s28 }
  0x27   : > { %p1434_p11 = pneg %p1433_p5  ;;  %p1440_p7 = por %p1439_p4, %p1438_p9 }
  0x29   : > { %p1441_p10 = pnand %p1440_p7, %p1434_p11 }
  0x2b   : > { %1444 = shalt.err (!%p1441_p10)
}
  0x2c   : > { %s1530_s5 = smov 256   ;;  %s1531_s7 = smov 16  }
  0x2d   : > { %1352 = dma.hbm_to_vmem [thread:$0]  (!%p1633_p0), %s1627_s6, 4096, %s1629_s8, %s1638_s10, %s1530_s5, %s1530_s5, %s1531_s7  }
  0x2e   : > { %p174_p12 = scmp.lt.s32.totalorder %s1527_s17, 3  ;;  %p1995_p1 = scmp.ge.s32.totalorder %s1527_s17, 1 }
  0x30   : > { %p175_p3 = pnand %p1995_p1, %p174_p12 }
  0x31   : > { %s1670_s11 = sand.u32 (!%p175_p3), 1, %s1511_s13  }
  0x32   : > { %178 = sbr.rel (%p175_p3) target bundleno = 330 (0x14a), region = 32  ;;  %s1174_s18 = sshll.u32 (!%p175_p3), %s1670_s11, 8 }
  0x33   : > { %s181_s19 = scalar_lea.sflag (!%p175_p3), [#allocation3], %s1670_s11  ;;  %s1676_s21 = scalar_lea.vmem (!%p175_p3), [#allocation2], %s1174_s18 }
  0x39   : > { %1498 = dma.done.wait (%p1605_p8), %s181_s19, 4096  }
  0x3a   : > { %1500 = vsyncadd (%p1605_p8), %s181_s19, 4294963200  ;;  %v223_v0 = vlaneseq  ;;  %v1532_v1 = vmov 0.0   ;;  %v1533_v3 = vmov 0   ;;  %v235_v5 = vld [vmem:[%s1676_s21 + $0x8] sm:$0xff]  ;;  %v237_v6 = vld [vmem:[%s1676_s21 + $0x18] sm:$0xff]  ;;  %vm1534_vm5 = vmmov 1  }
  0x3b   : > { %330 = vmatprep.mubr.f32.mxu0 %v1532_v1  ;;  %432 = vmatprep.mubr.f32.mxu1 %v1532_v1  ;;  %v1177_v7 = vld [vmem:[%s1676_s21 + $0x28] sm:$0xff]  ;;  %v234_v10 = vld [vmem:[%s1676_s21] sm:$0xff]  ;;  %v236_v11 = vld [vmem:[%s1676_s21 + $0x10] sm:$0xff]  ;;  %vm259_vm7 = vcmask 130048   ;;  %s1865_s29 = scalar_lea.vmem [#allocation5], %s1174_s18  ;;  %s1310_s30 = sshll.u32 %s1519_s15, 12 }
  0x3c   : > { %v1684_v2 = vshrl.u32 %v223_v0, 7  ;;  %1414 = vset.pattern.permute.xlu0 %v1533_v3  ;;  %v1176_v13 = vld [vmem:[%s1676_s21 + $0x20] sm:$0xff]  ;;  %v1189_v14 = vld [vmem:[%s1676_s21 + $0x38] sm:$0xff]  ;;  %v1191_v15 = vld [vmem:[%s1676_s21 + $0x48] sm:$0xff]  ;;  %s1079_s4 = sshll.u32 %s1865_s29, 4  ;;  %s1930_s15 = scalar_lea.hbm %s1988_s3, %s1310_s30  ;;  %s1932_s4 = int_to_ptr.vmem [resolvable:$true] %s1079_s4 }
  0x3d   : > { %v1188_v18 = vld [vmem:[%s1676_s21 + $0x30] sm:$0xff]  ;;  %v1190_v19 = vld [vmem:[%s1676_s21 + $0x40] sm:$0xff]  ;;  %v1203_v23 = vld [vmem:[%s1676_s21 + $0x58] sm:$0xff]  ;;  %s1064_s18 = scalar_lea.sflag [#allocation4], %s1670_s11  ;;  %s1445_s19 = scalar_lea.vmem %s1932_s4, 4096 }
  0x3e   : > { %vm228_vm0 = vcmp.ge.s32.totalorder %v1684_v2, 2  ;;  %vm230_vm1 = vcmp.lt.s32.totalorder %v1684_v2, 4  ;;  %vm226_vm2 = vcmp.lt.s32.totalorder %v1684_v2, 2  ;;  %v1205_v24 = vld [vmem:[%s1676_s21 + $0x68] sm:$0xff]  ;;  %v1221_v25 = vld [vmem:[%s1676_s21 + $0x78] sm:$0xff]  ;;  %v1202_v30 = vld [vmem:[%s1676_s21 + $0x50] sm:$0xff]  ;;  %p1446_p8 = scmp.ne.s32.totalorder %s1932_s4, %s1445_s19 }
  0x3f   : > { %vm1689_vm3 = vmand %vm228_vm0, %vm230_vm1  ;;  %v248_v8 = vsel %vm226_vm2, %v1177_v7, %v235_v5  ;;  %v247_v16 = vsel %vm226_vm2, %v1176_v13, %v234_v10  ;;  %v357_v17 = vsel %vm226_vm2, %v1191_v15, %v1177_v7  ;;  %v356_v22 = vsel %vm226_vm2, %v1190_v19, %v1176_v13  ;;  %v1223_v29 = vld [vmem:[%s1676_s21 + $0x88] sm:$0xff]  ;;  %v1204_v31 = vld [vmem:[%s1676_s21 + $0x60] sm:$0xff]  ;;  %p2000_p9 = scmp.ne.s32.totalorder %s1992_s25, 0 }
  0x40   : > { %vm1180_vm4 = vmneg %vm1689_vm3  ;;  %v1311_v12 = vpack.c.bf16 %v237_v6, %v248_v8  ;;  %v1314_v20 = vpack.c.bf16 %v236_v11, %v247_v16  ;;  %v365_v21 = vsel %vm1689_vm3, %v235_v5, %v357_v17  ;;  %v364_v27 = vsel %vm1689_vm3, %v234_v10, %v356_v22  ;;  %v1736_v33 = vld [vmem:[%s1986_s1] sm:$0xff]  ;;  %v1220_v37 = vld [vmem:[%s1676_s21 + $0x70] sm:$0xff] }
  0x41   : > { %vm1700_vm6 = vmpackc.low %vm1534_vm5, %vm1180_vm4  ;;  %v1317_v26 = vpack.c.bf16 %v1189_v14, %v365_v21  ;;  %v460_v28 = vsel %vm226_vm2, %v1205_v24, %v1191_v15  ;;  %v1319_v32 = vpack.c.bf16 %v1188_v18, %v364_v27  ;;  %v563_v35 = vsel %vm226_vm2, %v1223_v29, %v1205_v24  ;;  %v1222_v38 = vld [vmem:[%s1676_s21 + $0x80] sm:$0xff]  ;;  %v1239_v43 = vld [vmem:[%s1676_s21 + $0x98] sm:$0xff]  ;;  %p1447_p11 = pnand %p1446_p8, %p2000_p9 }
  0x42   : > { %1313 = vmatprep.subr.msk.bf16.mxu0 %vm1700_vm6, %v1311_v12  ;;  %v468_v34 = vsel %vm1689_vm3, %v1177_v7, %v460_v28  ;;  %v459_v36 = vsel %vm226_vm2, %v1204_v31, %v1190_v19  ;;  %v571_v40 = vsel %vm1689_vm3, %v1191_v15, %v563_v35  ;;  %v562_v42 = vsel %vm226_vm2, %v1222_v38, %v1204_v31  ;;  %v1241_v44 = vld [vmem:[%s1676_s21 + $0xa8] sm:$0xff]  ;;  %v1257_v49 = vld [vmem:[%s1676_s21 + $0xb8] sm:$0xff]  ;;  %v1240_v51 = vld [vmem:[%s1676_s21 + $0xa0] sm:$0xff] }
  0x43   : > { %1316 = vmatpush1.bf16.msk.msra.mxu0 %vm1700_vm6, %v1314_v20  ;;  %1318 = vmatprep.subr.bf16.mxu1 %v1317_v26  ;;  %v1321_v39 = vpack.c.bf16 %v1203_v23, %v468_v34  ;;  %v467_v41 = vsel %vm1689_vm3, %v1176_v13, %v459_v36  ;;  %v1325_v45 = vpack.c.bf16 %v1221_v25, %v571_v40  ;;  %v1259_v50 = vld [vmem:[%s1676_s21 + $0xc8] sm:$0xff]  ;;  %v1258_v55 = vld [vmem:[%s1676_s21 + $0xc0] sm:$0xff]  ;;  %v1238_v62 = vld [vmem:[%s1676_s21 + $0x90] sm:$0xff]  ;;  %p1448_p0 = pneg %p1447_p11 }
  0x44   : > { %1320 = vmatpush1.bf16.msra.mxu1 %v1319_v32  ;;  %v1323_v46 = vpack.c.bf16 %v1202_v30, %v467_v41  ;;  %v570_v47 = vsel %vm1689_vm3, %v1190_v19, %v562_v42  ;;  %v666_v48 = vsel %vm226_vm2, %v1241_v44, %v1223_v29  ;;  %v769_v54 = vsel %vm226_vm2, %v1259_v50, %v1241_v44  ;;  %v1771_v56 = vld [vmem:[%s1986_s1 + $0x8] sm:$0xff]  ;;  %v1275_v5 = vld [vmem:[%s1676_s21 + $0xd8] sm:$0xff]  ;;  %v211_v7 = vld [vmem:[%s1987_s2] sm:$0xff] }
  0x45   : > { %1322 = vmatprep.subr.bf16.mxu0 %v1321_v39  ;;  %v1327_v52 = vpack.c.bf16 %v1220_v37, %v570_v47  ;;  %v674_v53 = vsel %vm1689_vm3, %v1205_v24, %v666_v48  ;;  %1326 = vmatprep.subr.bf16.mxu1 %v1325_v45  ;;  %v777_v58 = vsel %vm1689_vm3, %v1223_v29, %v769_v54  ;;  %v1277_v60 = vld [vmem:[%s1676_s21 + $0xe8] sm:$0xff]  ;;  %v1256_v8 = vld [vmem:[%s1676_s21 + $0xb0] sm:$0xff]  ;;  %v1276_v11 = vld [vmem:[%s1676_s21 + $0xe0] sm:$0xff] }
  0x46   : > { %1184 = vmatmul.mubr.msk.f32.vlgmr.msra.gmra.mrb[0].mxu0 %vm259_vm7, %v1736_v33  ;;  %v1329_v57 = vpack.c.bf16 %v1239_v43, %v674_v53  ;;  %v665_v59 = vsel %vm226_vm2, %v1240_v51, %v1222_v38  ;;  %v1333_v61 = vpack.c.bf16 %v1257_v49, %v777_v58  ;;  %v768_v0 = vsel %vm226_vm2, %v1258_v55, %v1240_v51  ;;  %v1293_v13 = vld [vmem:[%s1676_s21 + $0xf8] sm:$0xff]  ;;  %v1274_v20 = vld [vmem:[%s1676_s21 + $0xd0] sm:$0xff]  ;;  %v212_v22 = vld [vmem:[%s1987_s2 + $0x8] sm:$0xff] }
  0x47   : > { %1324 = vmatpush1.bf16.msra.mxu0 %v1323_v46  ;;  %1194 = vmatmul.mubr.msk.f32.vlgmr.msra.gmra.mrb[0].mxu1 %vm259_vm7, %v1736_v33  ;;  %v673_v63 = vsel %vm1689_vm3, %v1204_v31, %v665_v59  ;;  %v970_v3 = vsel %vm226_vm2, 0.0, %v1277_v60  ;;  %v872_v6 = vsel %vm226_vm2, %v1277_v60, %v1259_v50  ;;  %v776_v9 = vsel %vm1689_vm3, %v1222_v38, %v768_v0  ;;  %v1292_v2 = vld [vmem:[%s1676_s21 + $0xf0] sm:$0xff]  ;;  %s1535_s21 = smov [#allocation5]  }
  0x48   : > { %336 = vmatprep.mubr.f32.mxu0 %v1532_v1  ;;  %1328 = vmatpush1.bf16.msra.mxu1 %v1327_v52  ;;  %v880_v10 = vsel %vm1689_vm3, %v1241_v44, %v872_v6  ;;  %v1331_v12 = vpack.c.bf16 %v1238_v62, %v673_v63  ;;  %v978_v14 = vsel %vm1689_vm3, %v1259_v50, %v970_v3  ;;  %v969_v19 = vsel %vm226_vm2, 0.0, %v1276_v11  ;;  %s1449_s24 = sshll.u32 %s1535_s21, 4  ;;  %s1450_s24 = int_to_ptr.vmem [resolvable:$false] %s1449_s24 }
  0x49   : > { %438 = vmatprep.mubr.f32.mxu1 %v1532_v1  ;;  %1330 = vmatprep.subr.bf16.mxu0 %v1329_v57  ;;  %v1337_v15 = vpack.c.bf16 %v1275_v5, %v880_v10  ;;  %v1335_v16 = vpack.c.bf16 %v1256_v8, %v776_v9  ;;  %v871_v17 = vsel %vm226_vm2, %v1276_v11, %v1258_v55  ;;  %s1451_s6 = scalar_lea.vmem %s1450_s24, 8192  ;;  %p1452_p6 = scmp.lt.s32.totalorder %s1932_s4, %s1450_s24 }
  0x4a   : > { %1185 = vmatmul.mubr.msk.f32.gmra.mrb[2].mxu0 %vm259_vm7, %v1771_v56  ;;  %1334 = vmatprep.subr.bf16.mxu1 %v1333_v61  ;;  %v1341_v18 = vpack.c.bf16 %v1293_v13, %v978_v14  ;;  %v879_v21 = vsel %vm1689_vm3, %v1240_v51, %v871_v17  ;;  %v977_v23 = vsel %vm1689_vm3, %v1258_v55, %v969_v19  ;;  %p1453_p13 = scmp.lt.s32.totalorder %s1451_s6, %s1445_s19 }
  0x4b   : > { %535 = vmatprep.mubr.f32.mxu0 %v1532_v1  ;;  %1195 = vmatmul.mubr.msk.f32.gmra.mrb[2].mxu1 %vm259_vm7, %v1771_v56  ;;  %v1339_v24 = vpack.c.bf16 %v1274_v20, %v879_v21  ;;  %v1343_v25 = vpack.c.bf16 %v1292_v2, %v977_v23 }
  0x4c   : > { %215 = vperm.xlu0 %1414, %v211_v7   ;;  %638 = vmatprep.mubr.f32.mxu1 %v1532_v1  ;;  %p1454_p2 = por %p1453_p13, %p1452_p6 }
  0x4e   : > { %1212 = vmatmul.mubr.msk.f32.vlgmr.msra.gmra.mrb[4].mxu0 %vm259_vm7, %v1736_v33  ;;  %p1455_p5 = pnand %p1454_p2, %p1448_p0 }
  0x4f   : > { %1332 = vmatpush1.bf16.msra.mxu0 %v1331_v12  ;;  %541 = vmatprep.mubr.f32.mxu0 %v1532_v1 }
  0x50   : > { %1230 = vmatmul.mubr.msk.f32.vlgmr.msra.gmra.mrb[4].mxu1 %vm259_vm7, %v1736_v33  ;;  %1338 = vmatprep.subr.bf16.mxu0 %v1337_v15 }
  0x51   : > { %1336 = vmatpush1.bf16.msra.mxu1 %v1335_v16  ;;  %644 = vmatprep.mubr.f32.mxu1 %v1532_v1 }
  0x52   : > { %1213 = vmatmul.mubr.msk.f32.gmra.mrb[6].mxu0 %vm259_vm7, %v1771_v56  ;;  %1342 = vmatprep.subr.bf16.mxu1 %v1341_v18 }
  0x53   : > { %741 = vmatprep.mubr.f32.mxu0 %v1532_v1  ;;  %220 = vperm.xlu0 %1414, %v212_v22  }
  0x54   : > { %1231 = vmatmul.mubr.msk.f32.gmra.mrb[6].mxu1 %vm259_vm7, %v1771_v56 }
  0x55   : > { %844 = vmatprep.mubr.f32.mxu1 %v1532_v1 }
  0x56   : > { %1248 = vmatmul.mubr.msk.f32.vlgmr.msra.gmra.mrb[8].mxu0 %vm259_vm7, %v1736_v33 }
  0x57   : > { %1340 = vmatpush1.bf16.msra.mxu0 %v1339_v24  ;;  %747 = vmatprep.mubr.f32.mxu0 %v1532_v1 }
  0x58   : > { %1266 = vmatmul.mubr.msk.f32.vlgmr.msra.gmra.mrb[8].mxu1 %vm259_vm7, %v1736_v33 }
  0x59   : > { %1344 = vmatpush1.bf16.msra.mxu1 %v1343_v25  ;;  %850 = vmatprep.mubr.f32.mxu1 %v1532_v1 }
  0x5a   : > { %1249 = vmatmul.mubr.msk.f32.gmra.mrb[10].mxu0 %vm259_vm7, %v1771_v56 }
  0x5b   : > { %947 = vmatprep.mubr.f32.mxu0 %v1532_v1 }
  0x5c   : > { %1267 = vmatmul.mubr.msk.f32.gmra.mrb[10].mxu1 %vm259_vm7, %v1771_v56 }
  0x5d   : > { %1045 = vmatprep.mubr.f32.mxu1 %v1532_v1 }
  0x5e   : > { %1284 = vmatmul.mubr.msk.f32.vlgmr.msra.gmra.mrb[12].mxu0 %vm259_vm7, %v1736_v33 }
  0x5f   : > { %953 = vmatprep.mubr.f32.mxu0 %v1532_v1 }
  0x60   : > { %1298 = vmatmul.mubr.msk.f32.vlgmr.msra.gmra.mrb[12].mxu1 %vm259_vm7, %v1736_v33 }
  0x61   : > { %1051 = vmatprep.mubr.f32.mxu1 %v1532_v1 }
  0x62   : > { %1285 = vmatmul.mubr.msk.f32.gmra.mrb[14].mxu0 %vm259_vm7, %v1771_v56 }
  0x64   : > { %1299 = vmatmul.mubr.msk.f32.gmra.mrb[14].mxu1 %vm259_vm7, %v1771_v56 }
  0xcb   : > { %v1857_v4 = vpop.permute.xlu0 %215 }
  0xd2   : > { %v1861_v31 = vpop.permute.xlu0 %220 }
 0x119   : > { %v332_v26 = vpop.f32.mrb[0].mxu0 }
 0x11a   : > { %v333_v27 = vadd.f32 %v332_v26, %v1857_v4  ;;  %v334_v28 = vpop.f32.mrb[1].mxu0  ;;  %v434_v29 = vpop.f32.mrb[0].mxu1 }
 0x11b   : > { %v335_v30 = vadd.f32 %v334_v28, %v1857_v4  ;;  %v435_v1 = vadd.f32 %v434_v29, %v1857_v4  ;;  %v436_v32 = vpop.f32.mrb[1].mxu1 }
 0x11c   : > { %343 = vst [vmem:[%s1865_s29] sm:$0xff] %v333_v27  ;;  %v437_v33 = vadd.f32 %v436_v32, %v1857_v4 }
 0x11d   : > { %344 = vst [vmem:[%s1865_s29 + $0x8] sm:$0xff] %v335_v30  ;;  %v338_v34 = vpop.f32.mrb[2].mxu0  ;;  %1196 = vst [vmem:[%s1865_s29 + $0x20] sm:$0xff] %v435_v1 }
 0x11e   : > { %v339_v35 = vadd.f32 %v338_v34, %v1861_v31  ;;  %v340_v36 = vpop.f32.mrb[3].mxu0  ;;  %1197 = vst [vmem:[%s1865_s29 + $0x28] sm:$0xff] %v437_v33  ;;  %v440_v37 = vpop.f32.mrb[2].mxu1 }
 0x11f   : > { %v341_v38 = vadd.f32 %v340_v36, %v1861_v31  ;;  %v441_v39 = vadd.f32 %v440_v37, %v1861_v31  ;;  %v442_v40 = vpop.f32.mrb[3].mxu1 }
 0x120   : > { %345 = vst [vmem:[%s1865_s29 + $0x10] sm:$0xff] %v339_v35  ;;  %v443_v41 = vadd.f32 %v442_v40, %v1861_v31 }
 0x121   : > { %346 = vst [vmem:[%s1865_s29 + $0x18] sm:$0xff] %v341_v38  ;;  %v537_v42 = vpop.f32.mrb[4].mxu0  ;;  %1198 = vst [vmem:[%s1865_s29 + $0x30] sm:$0xff] %v441_v39 }
 0x122   : > { %v538_v43 = vadd.f32 %v537_v42, %v1857_v4  ;;  %v539_v44 = vpop.f32.mrb[5].mxu0  ;;  %1199 = vst [vmem:[%s1865_s29 + $0x38] sm:$0xff] %v443_v41 }
 0x123   : > { %v640_v45 = vpop.f32.mrb[4].mxu1  ;;  %v540_v46 = vadd.f32 %v539_v44, %v1857_v4 }
 0x124   : > { %1214 = vst [vmem:[%s1865_s29 + $0x40] sm:$0xff] %v538_v43  ;;  %v641_v47 = vadd.f32 %v640_v45, %v1857_v4  ;;  %v642_v48 = vpop.f32.mrb[5].mxu1 }
 0x125   : > { %1215 = vst [vmem:[%s1865_s29 + $0x48] sm:$0xff] %v540_v46  ;;  %v643_v49 = vadd.f32 %v642_v48, %v1857_v4  ;;  %v543_v50 = vpop.f32.mrb[6].mxu0 }
 0x126   : > { %1232 = vst [vmem:[%s1865_s29 + $0x60] sm:$0xff] %v641_v47  ;;  %v544_v51 = vadd.f32 %v543_v50, %v1861_v31  ;;  %v545_v52 = vpop.f32.mrb[7].mxu0 }
 0x127   : > { %1233 = vst [vmem:[%s1865_s29 + $0x68] sm:$0xff] %v643_v49  ;;  %v646_v53 = vpop.f32.mrb[6].mxu1  ;;  %v546_v54 = vadd.f32 %v545_v52, %v1861_v31 }
 0x128   : > { %1216 = vst [vmem:[%s1865_s29 + $0x50] sm:$0xff] %v544_v51  ;;  %v647_v55 = vadd.f32 %v646_v53, %v1861_v31  ;;  %v648_v56 = vpop.f32.mrb[7].mxu1 }
 0x129   : > { %1217 = vst [vmem:[%s1865_s29 + $0x58] sm:$0xff] %v546_v54  ;;  %v649_v57 = vadd.f32 %v648_v56, %v1861_v31  ;;  %v743_v58 = vpop.f32.mrb[8].mxu0 }
 0x12a   : > { %1234 = vst [vmem:[%s1865_s29 + $0x70] sm:$0xff] %v647_v55  ;;  %v744_v59 = vadd.f32 %v743_v58, %v1857_v4  ;;  %v745_v60 = vpop.f32.mrb[9].mxu0 }
 0x12b   : > { %1235 = vst [vmem:[%s1865_s29 + $0x78] sm:$0xff] %v649_v57  ;;  %v846_v61 = vpop.f32.mrb[8].mxu1  ;;  %v746_v62 = vadd.f32 %v745_v60, %v1857_v4 }
 0x12c   : > { %1250 = vst [vmem:[%s1865_s29 + $0x80] sm:$0xff] %v744_v59  ;;  %v847_v63 = vadd.f32 %v846_v61, %v1857_v4  ;;  %v848_v0 = vpop.f32.mrb[9].mxu1 }
 0x12d   : > { %1251 = vst [vmem:[%s1865_s29 + $0x88] sm:$0xff] %v746_v62  ;;  %v849_v3 = vadd.f32 %v848_v0, %v1857_v4  ;;  %v749_v5 = vpop.f32.mrb[10].mxu0 }
 0x12e   : > { %1268 = vst [vmem:[%s1865_s29 + $0xa0] sm:$0xff] %v847_v63  ;;  %v750_v6 = vadd.f32 %v749_v5, %v1861_v31  ;;  %v751_v7 = vpop.f32.mrb[11].mxu0 }
 0x12f   : > { %1269 = vst [vmem:[%s1865_s29 + $0xa8] sm:$0xff] %v849_v3  ;;  %v852_v8 = vpop.f32.mrb[10].mxu1  ;;  %v752_v9 = vadd.f32 %v751_v7, %v1861_v31 }
 0x130   : > { %1252 = vst [vmem:[%s1865_s29 + $0x90] sm:$0xff] %v750_v6  ;;  %v853_v10 = vadd.f32 %v852_v8, %v1861_v31  ;;  %v854_v11 = vpop.f32.mrb[11].mxu1 }
 0x131   : > { %1253 = vst [vmem:[%s1865_s29 + $0x98] sm:$0xff] %v752_v9  ;;  %v855_v12 = vadd.f32 %v854_v11, %v1861_v31  ;;  %v949_v13 = vpop.f32.mrb[12].mxu0 }
 0x132   : > { %1270 = vst [vmem:[%s1865_s29 + $0xb0] sm:$0xff] %v853_v10  ;;  %v950_v14 = vadd.f32 %v949_v13, %v1857_v4  ;;  %v951_v15 = vpop.f32.mrb[13].mxu0 }
 0x133   : > { %1271 = vst [vmem:[%s1865_s29 + $0xb8] sm:$0xff] %v855_v12  ;;  %v1047_v16 = vpop.f32.mrb[12].mxu1  ;;  %v952_v17 = vadd.f32 %v951_v15, %v1857_v4 }
 0x134   : > { %1286 = vst [vmem:[%s1865_s29 + $0xc0] sm:$0xff] %v950_v14  ;;  %v1048_v18 = vadd.f32 %v1047_v16, %v1857_v4  ;;  %v1049_v19 = vpop.f32.mrb[13].mxu1 }
 0x135   : > { %1287 = vst [vmem:[%s1865_s29 + $0xc8] sm:$0xff] %v952_v17  ;;  %v1050_v20 = vadd.f32 %v1049_v19, %v1857_v4  ;;  %v955_v21 = vpop.f32.mrb[14].mxu0 }
 0x136   : > { %1300 = vst [vmem:[%s1865_s29 + $0xe0] sm:$0xff] %v1048_v18  ;;  %v956_v22 = vadd.f32 %v955_v21, %v1861_v31  ;;  %v957_v2 = vpop.f32.mrb[15].mxu0 }
 0x137   : > { %1301 = vst [vmem:[%s1865_s29 + $0xe8] sm:$0xff] %v1050_v20  ;;  %v958_v23 = vadd.f32 %v957_v2, %v1861_v31  ;;  %v1053_v24 = vpop.f32.mrb[14].mxu1 }
 0x138   : > { %1288 = vst [vmem:[%s1865_s29 + $0xd0] sm:$0xff] %v956_v22  ;;  %v1054_v25 = vadd.f32 %v1053_v24, %v1861_v31  ;;  %v1055_v26 = vpop.f32.mrb[15].mxu1 }
 0x139   : > { %1289 = vst [vmem:[%s1865_s29 + $0xd8] sm:$0xff] %v958_v23  ;;  %v1056_v4 = vadd.f32 %v1055_v26, %v1861_v31 }
 0x13a   : > { %1302 = vst [vmem:[%s1865_s29 + $0xf0] sm:$0xff] %v1054_v25 }
 0x13b   : > { %1303 = vst [vmem:[%s1865_s29 + $0xf8] sm:$0xff] %v1056_v4 }
 0x13c   : > { %1458 = shalt.err (!%p1455_p5)
}
 0x13d   : > { %s1459_s8 = scalar_lea.hbm %s1930_s15, 4096  ;;  %s1463_s22 = scalar_lea.hbm %s1988_s3, 8192 }
 0x13e   : > { %p1460_p4 = scmp.ne.s32.totalorder %s1930_s15, %s1459_s8  ;;  %p1464_p12 = scmp.lt.u32.totalorder %s1930_s15, %s1988_s3 }
 0x13f   : > { %p1465_p1 = scmp.lt.u32.totalorder %s1463_s22, %s1459_s8  ;;  %p1467_p8 = scmp.lt.u32.totalorder %s1459_s8, %s1930_s15 }
 0x140   : > { %p1461_p7 = pnand %p1460_p4, %p2000_p9 }
 0x141   : > { %p1466_p3 = por %p1465_p1, %p1464_p12 }
 0x142   : > { %p1462_p10 = pneg %p1461_p7 }
 0x143   : > { %p1468_p11 = por %p1467_p8, %p1466_p3 }
 0x145   : > { %p1469_p0 = pnand %p1468_p11, %p1462_p10 }
 0x147   : > { %1472 = shalt.err (!%p1469_p0)
}
 0x148   : > { %s1536_s29 = smov 256   ;;  %s1537_s30 = smov 16  }
 0x149   : > { %1347 = dma.vmem_to_hbm [thread:$0]  (%p2000_p9), %s1932_s4, 4096, %s1930_s15, %s1064_s18, %s1536_s29, %s1536_s29, %s1537_s30  }
 0x14a PF: > { %s1094_s5 = sand.u32 1, %s1507_s12   ;;  %p2001_p6 = scmp.ne.s32.totalorder %s1993_s27, 0 }
 0x14b   : > { %p2002_p13 = scmp.ge.s32.totalorder %s1527_s17, 2  ;;  %s1095_s7 = scalar_lea.sflag [#allocation4], %s1094_s5 }
 0x14d   : > { %p1354_p2 = pnand %p2002_p13, %p2001_p6 }
 0x14f   : > { %1502 = dma.done.wait (!%p1354_p2), %s1095_s7, 4096  }
 0x150   : > { %1504 = vsyncadd (!%p1354_p2), %s1095_s7, 4294963200  ;;  %s19_s17 = sadd.s32 1, %s1527_s17   ;;  %s2003_s12 = smov %s1511_s13 }
 0x151   : > { %p16_p5 = scmp.ge.s32.totalorder %s19_s17, 4   ;;  %s2004_s13 = smov %s1515_s14 }
 0x152   : > { %s2005_s14 = smov %s1614_s26  ;;  %s2006_s15 = smov %s1523_s16 }
 0x153   : > { %s2007_s16 = smov %s2009_s20  ;;  %18 = sbr.rel (!%p16_p5) target bundleno = 6 (0x6), region = 91 }
 0x15a   :  { %1100 = vsyncpa [#allocation3], 1 }
 0x15b   :  { %1102 = vsyncpa [#allocation3 + $0x1], 1 }
 0x15c   :  { %1103 = vsyncpa [#allocation4], 1 }
 0x15d   :  { %1105 = vsyncpa [#allocation4 + $0x1], 1 }

</bundles_post_ra>
